<compile_context>
chip_gen: v6e
topology: v6e:2x2x1
jax: 0.10.0
libtpu: 0.0.40
codegen_flags: <defaults>
</compile_context>

<pallas_src>
import jax
import jax.numpy as jnp
from jax.experimental import pallas as pl
from jax.experimental.pallas import tpu as pltpu

# Layer sizes from the module's __init__ (input_size=768 default).
DIMS = (768, 1024, 128, 64, 16, 1)
LANES = 128  # MXU/lane width used to pad the folded weight's N dim


def _round_up(n, m):
    return ((n + m - 1) // m) * m


def _fold_affine(params):
    """Collapse the Linear/Dropout(eval) chain into (w: [768, 1], b: [1, 1]).

    Right-to-left association keeps the fold at ~1 MFLOP (trailing dim is 1).
    Done with plain jnp ops at trace time, outside the kernel, in f32.
    """
    ws, bs = params[0::2], params[1::2]
    w = ws[-1].astype(jnp.float32)                  # [16, 1]
    b = bs[-1].astype(jnp.float32).reshape(1, -1)   # [1, 1]
    for wi, bi in zip(reversed(ws[:-1]), reversed(bs[:-1])):
        b = jnp.dot(bi.astype(jnp.float32).reshape(1, -1), w) + b
        w = jnp.dot(wi.astype(jnp.float32), w)
    return w, b                                      # [768, 1], [1, 1]


def _mlp_kernel(x_ref, w_ref, b_ref, o_ref):
    # One MXU matmul per batch tile: [tb, 768] @ [768, 128] (only lane 0 of the
    # weight is non-zero), f32 accumulation, bias add on the VPU, store col 0.
    y = jnp.dot(x_ref[...], w_ref[...], preferred_element_type=jnp.float32)
    o_ref[...] = (y[:, :1] + b_ref[...]).astype(o_ref.dtype)


def _choose_tile(B, block_rows, itemsize):
    """Batch tile: as large as possible (amortize per-step overhead), but keep
    the grid >= ~4 steps for large B so both v7x TensorCores get work."""
    sub = 8 if itemsize >= 4 else 16          # sublane packing (16 for bf16)
    if B <= sub:
        return B                              # single block == full array dim
    tb = min(block_rows, _round_up(pl.cdiv(B, 4), sub))
    tb = min(tb, _round_up(B, sub))
    return max(sub, _round_up(tb, sub))


def mlp_forward(x, params, *, block_rows=2048):
    """x: [B, 768]; params: flat tuple (w1, b1, ..., w5, b5) with w_i [in, out]."""
    B, D = x.shape
    assert D == DIMS[0], (D, DIMS[0])

    # Fold the purely-affine chain once per call (tiny; handled by XLA), then
    # zero-pad the N dim to 128 lanes to guarantee the MXU matmul path.
    w_fold, b_fold = _fold_affine(params)
    w_pad = jnp.zeros((DIMS[0], LANES), jnp.float32).at[:, :1].set(w_fold)
    w_pad = w_pad.astype(x.dtype)             # matvec in x's dtype, f32 accum
    b_fold = b_fold.astype(jnp.float32)       # [1, 1]

    tb = _choose_tile(B, block_rows, jnp.dtype(x.dtype).itemsize)
    grid = (pl.cdiv(B, tb),)                  # partial last block is masked

    out = pl.pallas_call(
        _mlp_kernel,
        out_shape=jax.ShapeDtypeStruct((B, 1), jnp.float32),
        grid=grid,
        in_specs=[
            pl.BlockSpec((tb, DIMS[0]), lambda i: (i, 0)),   # streamed x tiles
            pl.BlockSpec((DIMS[0], LANES), lambda i: (0, 0)),  # resident weight
            pl.BlockSpec((1, 1), lambda i: (0, 0)),          # resident bias
        ],
        out_specs=pl.BlockSpec((tb, 1), lambda i: (i, 0)),
        compiler_params=pltpu.CompilerParams(
            dimension_semantics=("parallel",),               # megacore-splittable
            vmem_limit_bytes=32 * 1024 * 1024,               # headroom on v5e
        ),
    )(x, w_pad, b_fold)
    return out


def init_params(key):
    """Deterministic init matching PyTorch nn.Linear default U[-1/sqrt(fan_in), +]."""
    params = []
    for i in range(len(DIMS) - 1):
        fan_in, fan_out = DIMS[i], DIMS[i + 1]
        key, kw, kb = jax.random.split(key, 3)
        bound = 1.0 / (fan_in ** 0.5)
        w = jax.random.uniform(kw, (fan_in, fan_out), jnp.float32, -bound, bound)
        b = jax.random.uniform(kb, (1, fan_out), jnp.float32, -bound, bound)
        params += [w, b]
    return tuple(params)


def reference_forward(x, params):
    # Un-folded reference: the original chain of 5 Linear layers (eval-mode
    # dropout = identity), used to validate the affine collapse.
    h = x
    for i in range(0, len(params), 2):
        h = h @ params[i] + params[i + 1]
    return h


if __name__ == "__main__":
    key = jax.random.PRNGKey(0)
    key, kx1 = jax.random.split(key)
    params = init_params(key)

    # Case 1: small batch, single grid step (tb == B == 8).
    B1 = 8
    x1 = jax.random.normal(kx1, (B1, DIMS[0]), jnp.float32)
    out1 = jax.block_until_ready(mlp_forward(x1, params))
    ref1 = reference_forward(x1, params)
    assert out1.shape == (B1, 1), out1.shape
    assert jnp.allclose(out1, ref1, atol=5e-4, rtol=5e-4), (out1, ref1)

    # Case 2: ragged batch (B=20). Default tile logic -> tb=16, grid=2 with a
    # masked partial last block (no wrapper-side padding of x).
    key, kx2 = jax.random.split(key)
    B2 = 20
    x2 = jax.random.normal(kx2, (B2, DIMS[0]), jnp.float32)
    out2 = jax.block_until_ready(mlp_forward(x2, params))
    ref2 = reference_forward(x2, params)
    assert out2.shape == (B2, 1), out2.shape
    assert jnp.allclose(out2, ref2, atol=5e-4, rtol=5e-4), (out2, ref2)

    # Case 3: same ragged batch with a tiny user-forced tile to exercise a
    # longer grid (3 steps) plus the masked partial last block.
    out3 = jax.block_until_ready(mlp_forward(x2, params, block_rows=8))
    assert out3.shape == (B2, 1), out3.shape
    assert jnp.allclose(out3, ref2, atol=5e-4, rtol=5e-4), (out3, ref2)

    print("KERNEL_OK")
</pallas_src>

<mosaic_0001>
module attributes {stable_mosaic.version = 11 : i64} {
  func.func @_mlp_kernel(%arg0: i32, %arg1: memref<8x768xf32, #tpu.memory_space<vmem>>, %arg2: memref<768x128xf32, #tpu.memory_space<vmem>>, %arg3: memref<1x1xf32, #tpu.memory_space<vmem>>, %arg4: memref<8x1xf32, #tpu.memory_space<vmem>>) attributes {dimension_semantics = [#tpu.dimension_semantics<parallel>], iteration_bounds = array<i64: 1>, scalar_prefetch = 0 : i64, scratch_operands = 0 : i64, tpu.core_type = #tpu.core_type<tc>, window_params = [{transform_indices = @transform_0, window_bounds = array<i64: 8, 768>}, {pipeline_mode = #tpu.pipeline_mode<synchronous>, transform_indices = @transform_1, window_bounds = array<i64: 768, 128>}, {pipeline_mode = #tpu.pipeline_mode<synchronous>, transform_indices = @transform_2, window_bounds = array<i64: 1, 1>}, {transform_indices = @transform_3, window_bounds = array<i64: 8, 1>}]} {
    %c0 = arith.constant 0 : index
    %c0_0 = arith.constant 0 : index
    %0 = vector.load %arg1[%c0, %c0_0] : memref<8x768xf32, #tpu.memory_space<vmem>>, vector<8x768xf32>
    %c0_1 = arith.constant 0 : index
    %c0_2 = arith.constant 0 : index
    %1 = vector.load %arg2[%c0_1, %c0_2] : memref<768x128xf32, #tpu.memory_space<vmem>>, vector<768x128xf32>
    %cst = arith.constant dense<0.000000e+00> : vector<8x128xf32>
    %2 = tpu.matmul %0, %1, %cst {dimension_numbers = #tpu.dot_dimension_numbers<[1], [0], [0], [1], [0, 0, 1, 1], [], []>} : vector<8x768xf32>, vector<768x128xf32>, vector<8x128xf32> -> vector<8x128xf32>
    %3 = vector.extract_strided_slice %2 {offsets = [0, 0], sizes = [8, 1], strides = [1, 1]} : vector<8x128xf32> to vector<8x1xf32>
    %c0_3 = arith.constant 0 : index
    %c0_4 = arith.constant 0 : index
    %4 = vector.load %arg3[%c0_3, %c0_4] : memref<1x1xf32, #tpu.memory_space<vmem>>, vector<1x1xf32>
    %5 = vector.broadcast %4 : vector<1x1xf32> to vector<8x1xf32>
    %6 = arith.addf %3, %5 : vector<8x1xf32>
    %c0_5 = arith.constant 0 : index
    %c0_6 = arith.constant 0 : index
    %7 = vector.load %arg4[%c0_5, %c0_6] : memref<8x1xf32, #tpu.memory_space<vmem>>, vector<8x1xf32>
    tpu.vector_store %arg4[%c0_5, %c0_6], %6 {strides = array<i32>} : memref<8x1xf32, #tpu.memory_space<vmem>>, vector<8x1xf32>,
    return
  }
  func.func @transform_0(%arg0: i32) -> (i32, i32) {
    %c0_i32 = arith.constant 0 : i32
    %c0_i32_0 = arith.constant 0 : i32
    return %arg0, %c0_i32 : i32, i32
  }
  func.func @transform_1(%arg0: i32) -> (i32, i32) {
    %c0_i32 = arith.constant 0 : i32
    %c0_i32_0 = arith.constant 0 : i32
    %c0_i32_1 = arith.constant 0 : i32
    return %c0_i32, %c0_i32_0 : i32, i32
  }
  func.func @transform_2(%arg0: i32) -> (i32, i32) {
    %c0_i32 = arith.constant 0 : i32
    %c0_i32_0 = arith.constant 0 : i32
    %c0_i32_1 = arith.constant 0 : i32
    return %c0_i32, %c0_i32_0 : i32, i32
  }
  func.func @transform_3(%arg0: i32) -> (i32, i32) {
    %c0_i32 = arith.constant 0 : i32
    %c0_i32_0 = arith.constant 0 : i32
    return %arg0, %c0_i32 : i32, i32
  }
}

</mosaic_0001>

<bundles_post_ra>
// kernel: tpu_custom_call.1
= control target key start
LH: loop header
LB: loop body
LE: loop exit
PB: predicated region body
PF: predicated region fallthrough
CT: control target
= control target key end

     0   :  { %s560_s0 = inlined_call_operand.hbm [shape: f32[8,768], index: 0, kind: input, shape index: {}]   ;;  %s561_s1 = inlined_call_operand.hbm [shape: f32[768,128], index: 1, kind: input, shape index: {}]   ;;  %s562_s2 = inlined_call_operand.<no memory space> [shape: f32[1,1], index: 2, kind: input, shape index: {}]   ;;  %s563_s3 = inlined_call_operand.vmem [shape: f32[8,1], index: 3, kind: output, shape index: {}]  }
   0x1   :  { %v8_v0 = vstv %s562_s2 }
   0x2   :  { %9 = vst [vmem:[#allocation2] sm:$0x1] %v8_v0 }
   0x3   :  { %10 = vsyncpa [#allocation4], 0 }
   0x4   :  { %11 = vsyncpa [#allocation6], 0  ;;  %s524_s14 = smov [#allocation3]   ;;  %s525_s16 = smov [#allocation5]  }
   0x5   :  { %s18_s15 = sshll.u32 %s524_s14, 4  ;;  %s27_s17 = sshll.u32 %s525_s16, 4  ;;  %s19_s15 = int_to_ptr.vmem [resolvable:$true] %s18_s15  ;;  %s28_s17 = int_to_ptr.vmem [resolvable:$true] %s27_s17 }
   0x6   :  { %s488_s18 = scalar_lea.vmem %s19_s15, 768  ;;  %p493_p1 = scmp.lt.s32.totalorder %s19_s15, %s19_s15 }
   0x7   :  { %p489_p0 = scmp.ne.s32.totalorder %s19_s15, %s488_s18  ;;  %p494_p2 = scmp.lt.s32.totalorder %s488_s18, %s488_s18 }
   0x9   :  { %p495_p3 = por %p494_p2, %p493_p1 }
   0xb   :  { %p496_p4 = pnand %p495_p3, %p489_p0 }
   0xd   :  { %499 = shalt.err (!%p496_p4)
}
   0xe   :  { %21 = dma.hbm_to_vmem [thread:$0]  %s560_s0, 768, %s19_s15, [#allocation4]  }
   0xf   :  { %s508_s2 = scalar_lea.vmem %s28_s17, 12288  ;;  %p513_p6 = scmp.lt.s32.totalorder %s28_s17, %s28_s17 }
  0x10   :  { %p509_p5 = scmp.ne.s32.totalorder %s28_s17, %s508_s2  ;;  %p514_p7 = scmp.lt.s32.totalorder %s508_s2, %s508_s2 }
  0x12   :  { %p515_p8 = por %p514_p7, %p513_p6 }
  0x14   :  { %p516_p9 = pnand %p515_p8, %p509_p5 }
  0x16   :  { %519 = shalt.err (!%p516_p9)
}
  0x17   :  { %s526_s21 = smov 128   ;;  %s527_s22 = smov 8  }
  0x18   :  { %33 = dma.hbm_to_vmem [thread:$0]  %s561_s1, 12288, %s28_s17, [#allocation6], %s526_s21, %s526_s21, %s527_s22  }
  0x19   :  { %520 = dma.done.wait [#allocation4], 768  }
  0x1a   :  { %521 = vsyncadd [#allocation4], 4294966528 }
  0x1b   :  { %522 = dma.done.wait [#allocation6], 12288  }
  0x1c   :  { %523 = vsyncadd [#allocation6], 4294955008  ;;  %v79_v1 = vld [vmem:[#allocation5 + $0xf8] sm:$0xff]  ;;  %v78_v5 = vld [vmem:[#allocation5 + $0xf0] sm:$0xff]  ;;  %vm362_vm0 = vcmask 7168  }
  0x1d   :  { %v111_v2 = vld [vmem:[#allocation5 + $0x1f8] sm:$0xff]  ;;  %371 = vmatprep.subr.mxu0 %v79_v1  ;;  %v110_v6 = vld [vmem:[#allocation5 + $0x1f0] sm:$0xff]  ;;  %v77_v9 = vld [vmem:[#allocation5 + $0xe8] sm:$0xff] }
  0x1e   :  { %v63_v3 = vld [vmem:[#allocation5 + $0x78] sm:$0xff]  ;;  %406 = vmatprep.subr.mxu1 %v111_v2  ;;  %v62_v7 = vld [vmem:[#allocation5 + $0x70] sm:$0xff]  ;;  %v109_v10 = vld [vmem:[#allocation5 + $0x1e8] sm:$0xff] }
  0x1f   :  { %v95_v4 = vld [vmem:[#allocation5 + $0x178] sm:$0xff]  ;;  %372 = vmatpush3.msra.mxu0 %v63_v3  ;;  %v94_v8 = vld [vmem:[#allocation5 + $0x170] sm:$0xff]  ;;  %v61_v11 = vld [vmem:[#allocation5 + $0x68] sm:$0xff] }
  0x20   :  { %407 = vmatpush3.msra.mxu1 %v95_v4  ;;  %373 = vmatprep.subr.mxu0 %v78_v5  ;;  %v93_v12 = vld [vmem:[#allocation5 + $0x168] sm:$0xff]  ;;  %v76_v13 = vld [vmem:[#allocation5 + $0xe0] sm:$0xff]  ;;  %v75_v17 = vld [vmem:[#allocation5 + $0xd8] sm:$0xff] }
  0x21   :  { %408 = vmatprep.subr.mxu1 %v110_v6  ;;  %374 = vmatpush3.msra.mxu0 %v62_v7  ;;  %v108_v14 = vld [vmem:[#allocation5 + $0x1e0] sm:$0xff]  ;;  %v107_v18 = vld [vmem:[#allocation5 + $0x1d8] sm:$0xff]  ;;  %v74_v21 = vld [vmem:[#allocation5 + $0xd0] sm:$0xff] }
  0x22   :  { %409 = vmatpush3.msra.mxu1 %v94_v8  ;;  %375 = vmatprep.subr.mxu0 %v77_v9  ;;  %v60_v15 = vld [vmem:[#allocation5 + $0x60] sm:$0xff]  ;;  %v59_v19 = vld [vmem:[#allocation5 + $0x58] sm:$0xff]  ;;  %v106_v22 = vld [vmem:[#allocation5 + $0x1d0] sm:$0xff] }
  0x23   :  { %410 = vmatprep.subr.mxu1 %v109_v10  ;;  %v92_v16 = vld [vmem:[#allocation5 + $0x160] sm:$0xff]  ;;  %376 = vmatpush3.msra.mxu0 %v61_v11  ;;  %v91_v20 = vld [vmem:[#allocation5 + $0x158] sm:$0xff]  ;;  %v58_v23 = vld [vmem:[#allocation5 + $0x50] sm:$0xff] }
  0x24   :  { %411 = vmatpush3.msra.mxu1 %v93_v12  ;;  %377 = vmatprep.subr.mxu0 %v76_v13  ;;  %v90_v24 = vld [vmem:[#allocation5 + $0x150] sm:$0xff]  ;;  %v73_v25 = vld [vmem:[#allocation5 + $0xc8] sm:$0xff]  ;;  %v72_v29 = vld [vmem:[#allocation5 + $0xc0] sm:$0xff] }
  0x25   :  { %412 = vmatprep.subr.mxu1 %v108_v14  ;;  %378 = vmatpush3.msra.mxu0 %v60_v15  ;;  %v105_v26 = vld [vmem:[#allocation5 + $0x1c8] sm:$0xff]  ;;  %v104_v30 = vld [vmem:[#allocation5 + $0x1c0] sm:$0xff]  ;;  %v71_v33 = vld [vmem:[#allocation5 + $0xb8] sm:$0xff] }
  0x26   :  { %413 = vmatpush3.msra.mxu1 %v92_v16  ;;  %379 = vmatprep.subr.mxu0 %v75_v17  ;;  %v57_v27 = vld [vmem:[#allocation5 + $0x48] sm:$0xff]  ;;  %v56_v31 = vld [vmem:[#allocation5 + $0x40] sm:$0xff]  ;;  %v103_v34 = vld [vmem:[#allocation5 + $0x1b8] sm:$0xff] }
  0x27   :  { %414 = vmatprep.subr.mxu1 %v107_v18  ;;  %380 = vmatpush3.msra.mxu0 %v59_v19  ;;  %v89_v28 = vld [vmem:[#allocation5 + $0x148] sm:$0xff]  ;;  %v88_v32 = vld [vmem:[#allocation5 + $0x140] sm:$0xff]  ;;  %v55_v35 = vld [vmem:[#allocation5 + $0x38] sm:$0xff] }
  0x28   :  { %415 = vmatpush3.msra.mxu1 %v91_v20  ;;  %381 = vmatprep.subr.mxu0 %v74_v21  ;;  %v87_v36 = vld [vmem:[#allocation5 + $0x138] sm:$0xff]  ;;  %v70_v37 = vld [vmem:[#allocation5 + $0xb0] sm:$0xff]  ;;  %v69_v41 = vld [vmem:[#allocation5 + $0xa8] sm:$0xff] }
  0x29   :  { %416 = vmatprep.subr.mxu1 %v106_v22  ;;  %382 = vmatpush3.msra.mxu0 %v58_v23  ;;  %v102_v38 = vld [vmem:[#allocation5 + $0x1b0] sm:$0xff]  ;;  %v101_v42 = vld [vmem:[#allocation5 + $0x1a8] sm:$0xff]  ;;  %v68_v45 = vld [vmem:[#allocation5 + $0xa0] sm:$0xff] }
  0x2a   :  { %417 = vmatpush3.msra.mxu1 %v90_v24  ;;  %383 = vmatprep.subr.mxu0 %v73_v25  ;;  %v54_v39 = vld [vmem:[#allocation5 + $0x30] sm:$0xff]  ;;  %v53_v43 = vld [vmem:[#allocation5 + $0x28] sm:$0xff]  ;;  %v100_v46 = vld [vmem:[#allocation5 + $0x1a0] sm:$0xff] }
  0x2b   :  { %418 = vmatprep.subr.mxu1 %v105_v26  ;;  %384 = vmatpush3.msra.mxu0 %v57_v27  ;;  %v86_v40 = vld [vmem:[#allocation5 + $0x130] sm:$0xff]  ;;  %v85_v44 = vld [vmem:[#allocation5 + $0x128] sm:$0xff]  ;;  %v52_v47 = vld [vmem:[#allocation5 + $0x20] sm:$0xff] }
  0x2c   :  { %419 = vmatpush3.msra.mxu1 %v89_v28  ;;  %385 = vmatprep.subr.mxu0 %v72_v29  ;;  %v84_v48 = vld [vmem:[#allocation5 + $0x120] sm:$0xff]  ;;  %v67_v49 = vld [vmem:[#allocation5 + $0x98] sm:$0xff]  ;;  %v66_v53 = vld [vmem:[#allocation5 + $0x90] sm:$0xff] }
  0x2d   :  { %420 = vmatprep.subr.mxu1 %v104_v30  ;;  %386 = vmatpush3.msra.mxu0 %v56_v31  ;;  %v99_v50 = vld [vmem:[#allocation5 + $0x198] sm:$0xff]  ;;  %v98_v54 = vld [vmem:[#allocation5 + $0x190] sm:$0xff]  ;;  %v65_v57 = vld [vmem:[#allocation5 + $0x88] sm:$0xff] }
  0x2e   :  { %421 = vmatpush3.msra.mxu1 %v88_v32  ;;  %387 = vmatprep.subr.mxu0 %v71_v33  ;;  %v51_v51 = vld [vmem:[#allocation5 + $0x18] sm:$0xff]  ;;  %v50_v55 = vld [vmem:[#allocation5 + $0x10] sm:$0xff]  ;;  %v97_v58 = vld [vmem:[#allocation5 + $0x188] sm:$0xff] }
  0x2f   :  { %422 = vmatprep.subr.mxu1 %v103_v34  ;;  %388 = vmatpush3.msra.mxu0 %v55_v35  ;;  %v83_v52 = vld [vmem:[#allocation5 + $0x118] sm:$0xff]  ;;  %v82_v56 = vld [vmem:[#allocation5 + $0x110] sm:$0xff]  ;;  %v49_v59 = vld [vmem:[#allocation5 + $0x8] sm:$0xff] }
  0x30   :  { %423 = vmatpush3.msra.mxu1 %v87_v36  ;;  %389 = vmatprep.subr.mxu0 %v70_v37  ;;  %v81_v60 = vld [vmem:[#allocation5 + $0x108] sm:$0xff]  ;;  %v64_v61 = vld [vmem:[#allocation5 + $0x80] sm:$0xff]  ;;  %v43_v0 = vld [vmem:[#allocation3 + $0x8] sm:$0xff] }
  0x31   :  { %424 = vmatprep.subr.mxu1 %v102_v38  ;;  %390 = vmatpush3.msra.mxu0 %v54_v39  ;;  %v96_v62 = vld [vmem:[#allocation5 + $0x180] sm:$0xff]  ;;  %v45_v2 = vld [vmem:[#allocation3 + $0x18] sm:$0xff]  ;;  %v42_v3 = vld [vmem:[#allocation3] sm:$0xff] }
  0x32   :  { %425 = vmatpush3.msra.mxu1 %v86_v40  ;;  %391 = vmatprep.subr.mxu0 %v69_v41  ;;  %v48_v63 = vld [vmem:[#allocation5] sm:$0xff]  ;;  %v143_v5 = vld [vmem:[#allocation5 + $0x2f8] sm:$0xff]  ;;  %v142_v8 = vld [vmem:[#allocation5 + $0x2f0] sm:$0xff] }
  0x33   :  { %426 = vmatprep.subr.mxu1 %v101_v42  ;;  %392 = vmatpush3.msra.mxu0 %v53_v43  ;;  %v80_v1 = vld [vmem:[#allocation5 + $0x100] sm:$0xff]  ;;  %v127_v6 = vld [vmem:[#allocation5 + $0x278] sm:$0xff]  ;;  %v126_v9 = vld [vmem:[#allocation5 + $0x270] sm:$0xff] }
  0x34   :  { %427 = vmatpush3.msra.mxu1 %v85_v44  ;;  %393 = vmatprep.subr.mxu0 %v68_v45  ;;  %v44_v4 = vld [vmem:[#allocation3 + $0x10] sm:$0xff]  ;;  %v47_v7 = vld [vmem:[#allocation3 + $0x28] sm:$0xff]  ;;  %v141_v10 = vld [vmem:[#allocation5 + $0x2e8] sm:$0xff] }
  0x35   :  { %428 = vmatprep.subr.mxu1 %v100_v46  ;;  %394 = vmatpush3.msra.mxu0 %v52_v47  ;;  %v125_v11 = vld [vmem:[#allocation5 + $0x268] sm:$0xff]  ;;  %v140_v12 = vld [vmem:[#allocation5 + $0x2e0] sm:$0xff]  ;;  %v139_v14 = vld [vmem:[#allocation5 + $0x2d8] sm:$0xff] }
  0x36   :  { %429 = vmatpush3.msra.mxu1 %v84_v48  ;;  %395 = vmatprep.subr.mxu0 %v67_v49  ;;  %v124_v13 = vld [vmem:[#allocation5 + $0x260] sm:$0xff]  ;;  %v123_v15 = vld [vmem:[#allocation5 + $0x258] sm:$0xff]  ;;  %v138_v16 = vld [vmem:[#allocation5 + $0x2d0] sm:$0xff] }
  0x37   :  { %430 = vmatprep.subr.mxu1 %v99_v50  ;;  %396 = vmatpush3.msra.mxu0 %v51_v51  ;;  %v122_v17 = vld [vmem:[#allocation5 + $0x250] sm:$0xff]  ;;  %v137_v18 = vld [vmem:[#allocation5 + $0x2c8] sm:$0xff]  ;;  %v136_v20 = vld [vmem:[#allocation5 + $0x2c0] sm:$0xff] }
  0x38   :  { %431 = vmatpush3.msra.mxu1 %v83_v52  ;;  %397 = vmatprep.subr.mxu0 %v66_v53  ;;  %v121_v19 = vld [vmem:[#allocation5 + $0x248] sm:$0xff]  ;;  %v120_v21 = vld [vmem:[#allocation5 + $0x240] sm:$0xff]  ;;  %v135_v22 = vld [vmem:[#allocation5 + $0x2b8] sm:$0xff] }
  0x39   :  { %432 = vmatprep.subr.mxu1 %v98_v54  ;;  %398 = vmatpush3.msra.mxu0 %v50_v55  ;;  %v119_v23 = vld [vmem:[#allocation5 + $0x238] sm:$0xff]  ;;  %v134_v24 = vld [vmem:[#allocation5 + $0x2b0] sm:$0xff]  ;;  %v133_v26 = vld [vmem:[#allocation5 + $0x2a8] sm:$0xff] }
  0x3a   :  { %433 = vmatpush3.msra.mxu1 %v82_v56  ;;  %399 = vmatprep.subr.mxu0 %v65_v57  ;;  %v118_v25 = vld [vmem:[#allocation5 + $0x230] sm:$0xff]  ;;  %v117_v27 = vld [vmem:[#allocation5 + $0x228] sm:$0xff]  ;;  %v132_v28 = vld [vmem:[#allocation5 + $0x2a0] sm:$0xff] }
  0x3b   :  { %434 = vmatprep.subr.mxu1 %v97_v58  ;;  %400 = vmatpush3.msra.mxu0 %v49_v59  ;;  %v116_v29 = vld [vmem:[#allocation5 + $0x220] sm:$0xff]  ;;  %v131_v30 = vld [vmem:[#allocation5 + $0x298] sm:$0xff]  ;;  %v130_v32 = vld [vmem:[#allocation5 + $0x290] sm:$0xff] }
  0x3c   :  { %435 = vmatpush3.msra.mxu1 %v81_v60  ;;  %401 = vmatprep.subr.mxu0 %v64_v61  ;;  %v115_v31 = vld [vmem:[#allocation5 + $0x218] sm:$0xff]  ;;  %v114_v33 = vld [vmem:[#allocation5 + $0x210] sm:$0xff]  ;;  %v129_v34 = vld [vmem:[#allocation5 + $0x288] sm:$0xff] }
  0x3d   :  { %436 = vmatprep.subr.mxu1 %v96_v62  ;;  %402 = vmatpush3.msra.mxu0 %v48_v63  ;;  %v113_v35 = vld [vmem:[#allocation5 + $0x208] sm:$0xff]  ;;  %v128_v36 = vld [vmem:[#allocation5 + $0x280] sm:$0xff]  ;;  %v46_v38 = vld [vmem:[#allocation3 + $0x20] sm:$0xff] }
  0x3e   :  { %208 = vmatprep.mubr.f32.mxu0 %v43_v0  ;;  %437 = vmatpush3.msra.mxu1 %v80_v1  ;;  %v112_v37 = vld [vmem:[#allocation5 + $0x200] sm:$0xff]  ;;  %v370_v49 = vld [vmem:[#allocation2] ss:$0 sm:$0xff] }
  0x3f   :  { %278 = vmatprep.mubr.f32.mxu1 %v45_v2  ;;  %209 = vmatmul.mubr.f32.vlgmr.msra.gmra.mxu0 %v42_v3 }
  0x40   :  { %279 = vmatmul.mubr.f32.vlgmr.msra.gmra.mxu1 %v44_v4  ;;  %441 = vmatprep.subr.mxu0 %v143_v5 }
  0x41   :  { %348 = vmatprep.mubr.f32.mxu0 %v47_v7  ;;  %442 = vmatpush3.msra.mxu0 %v127_v6 }
  0x42   :  { %443 = vmatprep.subr.mxu0 %v142_v8 }
  0x43   :  { %444 = vmatpush3.msra.mxu0 %v126_v9 }
  0x44   :  { %445 = vmatprep.subr.mxu0 %v141_v10 }
  0x45   :  { %446 = vmatpush3.msra.mxu0 %v125_v11 }
  0x46   :  { %447 = vmatprep.subr.mxu0 %v140_v12 }
  0x47   :  { %448 = vmatpush3.msra.mxu0 %v124_v13 }
  0x48   :  { %449 = vmatprep.subr.mxu0 %v139_v14 }
  0x49   :  { %450 = vmatpush3.msra.mxu0 %v123_v15 }
  0x4a   :  { %451 = vmatprep.subr.mxu0 %v138_v16 }
  0x4b   :  { %452 = vmatpush3.msra.mxu0 %v122_v17 }
  0x4c   :  { %453 = vmatprep.subr.mxu0 %v137_v18 }
  0x4d   :  { %454 = vmatpush3.msra.mxu0 %v121_v19 }
  0x4e   :  { %455 = vmatprep.subr.mxu0 %v136_v20 }
  0x4f   :  { %456 = vmatpush3.msra.mxu0 %v120_v21 }
  0x50   :  { %457 = vmatprep.subr.mxu0 %v135_v22 }
  0x51   :  { %458 = vmatpush3.msra.mxu0 %v119_v23 }
  0x52   :  { %459 = vmatprep.subr.mxu0 %v134_v24 }
  0x53   :  { %460 = vmatpush3.msra.mxu0 %v118_v25 }
  0x54   :  { %461 = vmatprep.subr.mxu0 %v133_v26 }
  0x55   :  { %462 = vmatpush3.msra.mxu0 %v117_v27 }
  0x56   :  { %463 = vmatprep.subr.mxu0 %v132_v28 }
  0x57   :  { %464 = vmatpush3.msra.mxu0 %v116_v29 }
  0x58   :  { %465 = vmatprep.subr.mxu0 %v131_v30 }
  0x59   :  { %466 = vmatpush3.msra.mxu0 %v115_v31 }
  0x5a   :  { %467 = vmatprep.subr.mxu0 %v130_v32 }
  0x5b   :  { %468 = vmatpush3.msra.mxu0 %v114_v33 }
  0x5c   :  { %469 = vmatprep.subr.mxu0 %v129_v34 }
  0x5d   :  { %470 = vmatpush3.msra.mxu0 %v113_v35 }
  0x5e   :  { %471 = vmatprep.subr.mxu0 %v128_v36 }
  0x5f   :  { %472 = vmatpush3.msra.mxu0 %v112_v37 }
  0x60   :  { %349 = vmatmul.mubr.f32.vlgmr.msra.gmra.mxu0 %v46_v38 }
  0xff   :  { %v403_v39 = vpop.f32.mrf.mxu0 }
 0x100   :  { %v438_v40 = vpop.f32.mrf.mxu1 }
 0x101   :  { %v404_v41 = vpop.f32.mrf.mxu0 }
 0x102   :  { %v439_v42 = vpop.f32.mrf.mxu1  ;;  %v405_v43 = vadd.f32 %v404_v41, %v403_v39 }
 0x103   :  { %v440_v44 = vadd.f32 %v439_v42, %v438_v40 }
 0x105   :  { %v281_v47 = vadd.f32 %v440_v44, %v405_v43 }
 0x120   :  { %v473_v45 = vpop.f32.mrf.mxu0 }
 0x122   :  { %v474_v46 = vpop.f32.mrf.mxu0 }
 0x123   :  { %v475_v48 = vadd.f32 %v474_v46, %v473_v45 }
 0x125   :  { %v351_v50 = vadd.f32 %v475_v48, %v281_v47 }
 0x127   :  { %v361_v51 = vadd.f32 %v370_v49, %v351_v50 }
 0x129   :  { %363 = vst.msk [vmem:[%s563_s3] sm:$0xff] %vm362_vm0, %v361_v51 }
 0x12a   :  { %368 = vsyncpa [#allocation4], 1 }
 0x12b   :  { %369 = vsyncpa [#allocation6], 1 }

</bundles_post_ra>
